<compile_context>
chip_gen: v6e
topology: v6e:2x2x1
jax: 0.10.0
libtpu: 0.0.40
codegen_flags: <defaults>
</compile_context>

<pallas_src>
import jax
import jax.numpy as jnp
from jax.experimental import pallas as pl
from jax.experimental.pallas import tpu as pltpu


_NEG_BIG = -1e30            # bias on padded vocab columns -> exp underflows to 0
_LANE = 128
_SUBLANE_BF16 = 16
_VMEM_BUDGET = 40 * 1024 * 1024   # conservative; leaves headroom on v7x (64 MiB)
_VMEM_CAP = 48 * 1024 * 1024


def _round_up(x, m):
    return ((x + m - 1) // m) * m


# ---------------------------------------------------------------------------
# Kernels
# ---------------------------------------------------------------------------
def _single_pass_kernel(x_ref, w_ref, b_ref, o_ref):
    # x_ref: (TM, K) bf16   w_ref: (K, V) bf16   b_ref: (1, V) f32   o_ref: (TM, V)
    logits = jnp.dot(x_ref[...], w_ref[...],
                     preferred_element_type=jnp.float32) + b_ref[...]
    m = jnp.max(logits, axis=-1, keepdims=True)
    e = jnp.exp(logits - m)
    l = jnp.sum(e, axis=-1, keepdims=True)
    o_ref[...] = (e * pl.reciprocal(l, approx=False)).astype(o_ref.dtype)


def _two_pass_kernel(x_ref, w_ref, b_ref, o_ref, m_sc, l_sc):
    # Online softmax over streamed vocab tiles.  Grid: (rows, pass, vocab).
    pass_idx = pl.program_id(1)
    v_idx = pl.program_id(2)

    logits = jnp.dot(x_ref[...], w_ref[...],
                     preferred_element_type=jnp.float32) + b_ref[...]

    @pl.when(jnp.logical_and(pass_idx == 0, v_idx == 0))
    def _init():
        m_sc[...] = jnp.full_like(m_sc, _NEG_BIG)
        l_sc[...] = jnp.zeros_like(l_sc)

    @pl.when(pass_idx == 0)
    def _stats():
        m_prev = m_sc[...]
        m_new = jnp.maximum(m_prev, jnp.max(logits, axis=-1, keepdims=True))
        l_sc[...] = (l_sc[...] * jnp.exp(m_prev - m_new)
                     + jnp.sum(jnp.exp(logits - m_new), axis=-1, keepdims=True))
        m_sc[...] = m_new
        # No o_ref write: every pass-0 step maps the output to block (r, 0),
        # which stays resident (never flushed) and is overwritten by pass 1.

    @pl.when(pass_idx == 1)
    def _write():
        inv_l = pl.reciprocal(l_sc[...], approx=False)
        o_ref[...] = (jnp.exp(logits - m_sc[...]) * inv_l).astype(o_ref.dtype)


# ---------------------------------------------------------------------------
# One-time parameter preparation (hoisted out of the per-call wrapper)
# ---------------------------------------------------------------------------
def prepare_decoder_params(w, b):
    """Cast W to bf16 and pad the vocab axis to a multiple of 128 ONCE.

    Padded columns get a -1e30 bias so they never contribute to the softmax
    normalizer (logits stay f32 in-kernel, so the huge-negative trick is safe).
    Returns (w_bf16 [K, Vp], b_f32 [1, Vp], vocab_size).
    """
    k, v = w.shape
    assert b.shape == (v,)
    v_pad = _round_up(v, _LANE)
    if v_pad != v:
        w = jnp.pad(w, ((0, 0), (0, v_pad - v)))
        b = jnp.pad(b, (0, v_pad - v), constant_values=_NEG_BIG)
    return w.astype(jnp.bfloat16), b.astype(jnp.float32).reshape(1, v_pad), v


# ---------------------------------------------------------------------------
# Tile / VMEM footprint heuristics
# ---------------------------------------------------------------------------
def _single_pass_footprint(tm, k, v_pad, out_bytes):
    x_blk = 2 * tm * k * 2            # bf16, double-buffered
    w_blk = 2 * k * v_pad * 2         # bf16, double-buffered (conservative)
    b_blk = 2 * v_pad * 4
    o_blk = 2 * tm * v_pad * out_bytes
    interm = 3 * tm * v_pad * 4       # f32 logits / exp temporaries (estimate)
    return x_blk + w_blk + b_blk + o_blk + interm


def _two_pass_footprint(tm, tv, k, out_bytes):
    x_blk = 2 * tm * k * 2
    w_blk = 2 * k * tv * 2
    b_blk = 2 * tv * 4
    o_blk = 2 * tm * tv * out_bytes
    scr = 2 * tm * 4 * 2
    interm = 3 * tm * tv * 4
    return x_blk + w_blk + b_blk + o_blk + scr + interm


def _vmem_limit(footprint):
    return int(min(max(2 * footprint, 16 * 1024 * 1024), _VMEM_CAP))


# ---------------------------------------------------------------------------
# Forward
# ---------------------------------------------------------------------------
def base_decoder_forward(x, w_bf16, b_f32, vocab_size, *,
                         out_dtype=jnp.bfloat16, row_tile=256,
                         force_two_pass=False):
    """Decoder head forward: probs = softmax(x @ W + b) over the vocab axis.

    Expects (w_bf16, b_f32, vocab_size) from prepare_decoder_params().
    x: [N, input_size] f32/bf16.  Returns [N, vocab_size] probabilities in
    out_dtype (default bfloat16 -- halves HBM writeback vs f32).
    """
    n, k = x.shape
    k_w, v_pad = w_bf16.shape
    assert k == k_w and b_f32.shape == (1, v_pad)
    out_bytes = jnp.dtype(out_dtype).itemsize

    n16 = _round_up(n, _SUBLANE_BF16)
    tm_candidates = [t for t in (512, 256, 128, 64, 32, 16)
                     if t <= max(row_tile, 16)]

    # ---- single-pass fast path: whole vocab as one lane-dense block -------
    if not force_two_pass:
        for cand in tm_candidates:
            tm = min(cand, n16)
            fp = _single_pass_footprint(tm, k, v_pad, out_bytes)
            if fp <= _VMEM_BUDGET:
                n_pad = _round_up(n, tm)
                x_p = x.astype(jnp.bfloat16)
                if n_pad != n:
                    x_p = jnp.pad(x_p, ((0, n_pad - n), (0, 0)))
                out = pl.pallas_call(
                    _single_pass_kernel,
                    out_shape=jax.ShapeDtypeStruct((n_pad, v_pad), out_dtype),
                    grid_spec=pltpu.PrefetchScalarGridSpec(
                        num_scalar_prefetch=0,
                        grid=(n_pad // tm,),
                        in_specs=[
                            pl.BlockSpec((tm, k), lambda r: (r, 0)),
                            pl.BlockSpec((k, v_pad), lambda r: (0, 0)),
                            pl.BlockSpec((1, v_pad), lambda r: (0, 0)),
                        ],
                        out_specs=pl.BlockSpec((tm, v_pad), lambda r: (r, 0)),
                    ),
                    compiler_params=pltpu.CompilerParams(
                        dimension_semantics=("parallel",),
                        vmem_limit_bytes=_vmem_limit(fp),
                    ),
                )(x_p, w_bf16, b_f32)
                return out[:n, :vocab_size]

    # ---- fallback: two-pass online softmax over streamed vocab tiles ------
    tv_cands = [c for c in (2048, 1024, 512, 256, 128) if v_pad % c == 0]
    tm, tv = None, None
    for cand in tm_candidates:
        t_eff = min(cand, n16)
        for cand_tv in tv_cands:
            if _two_pass_footprint(t_eff, cand_tv, k, out_bytes) <= _VMEM_BUDGET:
                tm, tv = t_eff, cand_tv
                break
        if tm is not None:
            break
    if tm is None:
        # TODO(synk): tile K for huge input_size; smallest tiles as last resort.
        tm, tv = min(16, n16), 128

    n_pad = _round_up(n, tm)
    x_p = x.astype(jnp.bfloat16)
    if n_pad != n:
        x_p = jnp.pad(x_p, ((0, n_pad - n), (0, 0)))
    fp = _two_pass_footprint(tm, tv, k, out_bytes)

    out = pl.pallas_call(
        _two_pass_kernel,
        out_shape=jax.ShapeDtypeStruct((n_pad, v_pad), out_dtype),
        grid_spec=pltpu.PrefetchScalarGridSpec(
            num_scalar_prefetch=0,
            grid=(n_pad // tm, 2, v_pad // tv),
            in_specs=[
                pl.BlockSpec((tm, k), lambda r, p, vi: (r, 0)),
                pl.BlockSpec((k, tv), lambda r, p, vi: (0, vi)),
                pl.BlockSpec((1, tv), lambda r, p, vi: (0, vi)),
            ],
            # Pass 0 (p=0): all vocab steps map to block (r, 0) -> resident,
            # never flushed, overwritten by pass 1.  Pass 1 (p=1): (r, vi).
            out_specs=pl.BlockSpec((tm, tv), lambda r, p, vi: (r, vi * p)),
            scratch_shapes=[
                pltpu.VMEM((tm, 1), jnp.float32),   # running max per row
                pltpu.VMEM((tm, 1), jnp.float32),   # running sum per row
            ],
        ),
        compiler_params=pltpu.CompilerParams(
            dimension_semantics=("parallel", "arbitrary", "arbitrary"),
            vmem_limit_bytes=_vmem_limit(fp),
        ),
    )(x_p, w_bf16, b_f32)
    return out[:n, :vocab_size]


if __name__ == "__main__":
    # Small shapes: batch=2, seq=8 -> 16 token rows; input_size=32;
    # vocab_size=200 (non-multiple of 128) to exercise the vocab padding.
    batch, seq = 2, 8
    input_size, vocab_size = 32, 200

    key = jax.random.PRNGKey(0)
    kx, kw, kb = jax.random.split(key, 3)

    x = jax.random.normal(kx, (batch * seq, input_size), dtype=jnp.float32)
    # Synthetic parameters a concrete decoder subclass would own (vocab proj).
    w = jax.random.normal(kw, (input_size, vocab_size), dtype=jnp.float32) * 0.05
    b = jax.random.normal(kb, (vocab_size,), dtype=jnp.float32) * 0.01

    # One-time weight prep (cast + pad), then the fused forward.
    w_p, b_p, v = prepare_decoder_params(w, b)

    ref = jax.nn.softmax(x @ w + b[None, :], axis=-1)

    # Single-pass fast path (used for any shape that fits VMEM, incl. this one).
    probs = base_decoder_forward(x, w_p, b_p, v)
    probs = jax.block_until_ready(probs)
    assert probs.shape == (batch * seq, vocab_size)
    assert probs.dtype == jnp.bfloat16
    probs_f32 = probs.astype(jnp.float32)
    assert jnp.allclose(probs_f32, ref, atol=2e-3, rtol=5e-2)
    assert jnp.allclose(jnp.sum(probs_f32, axis=-1), 1.0, atol=2e-2)

    # Also exercise the streamed two-pass fallback path once for coverage.
    probs2 = base_decoder_forward(x, w_p, b_p, v, force_two_pass=True)
    probs2 = jax.block_until_ready(probs2)
    probs2_f32 = probs2.astype(jnp.float32)
    assert jnp.allclose(probs2_f32, ref, atol=2e-3, rtol=5e-2)
    assert jnp.allclose(jnp.sum(probs2_f32, axis=-1), 1.0, atol=2e-2)

    print("KERNEL_OK")
</pallas_src>

<mosaic_0001>
module attributes {stable_mosaic.version = 11 : i64} {
  func.func @_single_pass_kernel(%arg0: i32, %arg1: memref<16x32xbf16, #tpu.memory_space<vmem>>, %arg2: memref<32x256xbf16, #tpu.memory_space<vmem>>, %arg3: memref<1x256xf32, #tpu.memory_space<vmem>>, %arg4: memref<16x256xbf16, #tpu.memory_space<vmem>>) attributes {dimension_semantics = [#tpu.dimension_semantics<parallel>], iteration_bounds = array<i64: 1>, scalar_prefetch = 0 : i64, scratch_operands = 0 : i64, tpu.core_type = #tpu.core_type<tc>, window_params = [{transform_indices = @transform_0, window_bounds = array<i64: 16, 32>}, {pipeline_mode = #tpu.pipeline_mode<synchronous>, transform_indices = @transform_1, window_bounds = array<i64: 32, 256>}, {pipeline_mode = #tpu.pipeline_mode<synchronous>, transform_indices = @transform_2, window_bounds = array<i64: 1, 256>}, {transform_indices = @transform_3, window_bounds = array<i64: 16, 256>}]} {
    %c0 = arith.constant 0 : index
    %c0_0 = arith.constant 0 : index
    %0 = vector.load %arg1[%c0, %c0_0] : memref<16x32xbf16, #tpu.memory_space<vmem>>, vector<16x32xbf16>
    %c0_1 = arith.constant 0 : index
    %c0_2 = arith.constant 0 : index
    %1 = vector.load %arg2[%c0_1, %c0_2] : memref<32x256xbf16, #tpu.memory_space<vmem>>, vector<32x256xbf16>
    %cst = arith.constant dense<0.000000e+00> : vector<16x256xf32>
    %2 = tpu.matmul %0, %1, %cst {dimension_numbers = #tpu.dot_dimension_numbers<[1], [0], [0], [1], [0, 0, 1, 1], [], []>} : vector<16x32xbf16>, vector<32x256xbf16>, vector<16x256xf32> -> vector<16x256xf32>
    %c0_3 = arith.constant 0 : index
    %c0_4 = arith.constant 0 : index
    %3 = vector.load %arg3[%c0_3, %c0_4] : memref<1x256xf32, #tpu.memory_space<vmem>>, vector<1x256xf32>
    %4 = vector.broadcast %3 : vector<1x256xf32> to vector<16x256xf32>
    %5 = arith.addf %2, %4 : vector<16x256xf32>
    %cst_5 = arith.constant dense<0xFF800000> : vector<16xf32>
    %6 = vector.multi_reduction <maximumf>, %5, %cst_5 [1] : vector<16x256xf32> to vector<16xf32>
    %7 = vector.shape_cast %6 : vector<16xf32> to vector<16x1xf32>
    %8 = vector.broadcast %7 : vector<16x1xf32> to vector<16x256xf32>
    %9 = arith.subf %5, %8 : vector<16x256xf32>
    %10 = math.exp %9 : vector<16x256xf32>
    %cst_6 = arith.constant dense<0.000000e+00> : vector<16xf32>
    %11 = vector.multi_reduction <add>, %10, %cst_6 [1] : vector<16x256xf32> to vector<16xf32>
    %12 = vector.shape_cast %11 : vector<16xf32> to vector<16x1xf32>
    %13 = tpu.reciprocal %12 : vector<16x1xf32> -> vector<16x1xf32>
    %14 = vector.broadcast %13 : vector<16x1xf32> to vector<16x256xf32>
    %15 = arith.mulf %10, %14 : vector<16x256xf32>
    %16 = arith.truncf %15 : vector<16x256xf32> to vector<16x256xbf16>
    %c0_7 = arith.constant 0 : index
    %c0_8 = arith.constant 0 : index
    %17 = vector.load %arg4[%c0_7, %c0_8] : memref<16x256xbf16, #tpu.memory_space<vmem>>, vector<16x256xbf16>
    tpu.vector_store %arg4[%c0_7, %c0_8], %16 {strides = array<i32>} : memref<16x256xbf16, #tpu.memory_space<vmem>>, vector<16x256xbf16>,
    return
  }
  func.func @transform_0(%arg0: i32) -> (i32, i32) {
    %c0_i32 = arith.constant 0 : i32
    %c0_i32_0 = arith.constant 0 : i32
    return %arg0, %c0_i32 : i32, i32
  }
  func.func @transform_1(%arg0: i32) -> (i32, i32) {
    %c0_i32 = arith.constant 0 : i32
    %c0_i32_0 = arith.constant 0 : i32
    %c0_i32_1 = arith.constant 0 : i32
    return %c0_i32, %c0_i32_0 : i32, i32
  }
  func.func @transform_2(%arg0: i32) -> (i32, i32) {
    %c0_i32 = arith.constant 0 : i32
    %c0_i32_0 = arith.constant 0 : i32
    %c0_i32_1 = arith.constant 0 : i32
    return %c0_i32, %c0_i32_0 : i32, i32
  }
  func.func @transform_3(%arg0: i32) -> (i32, i32) {
    %c0_i32 = arith.constant 0 : i32
    %c0_i32_0 = arith.constant 0 : i32
    return %arg0, %c0_i32 : i32, i32
  }
}

</mosaic_0001>

<bundles_post_ra>
// kernel: tpu_custom_call.1
= control target key start
LH: loop header
LB: loop body
LE: loop exit
PB: predicated region body
PF: predicated region fallthrough
CT: control target
= control target key end

     0   :  { %8 = vsyncpa [#allocation3], 0  ;;  %s345_s0 = inlined_call_operand.hbm [shape: bf16[16,32], index: 0, kind: input, shape index: {}]   ;;  %s346_s1 = inlined_call_operand.hbm [shape: bf16[32,256], index: 1, kind: input, shape index: {}]   ;;  %s347_s2 = inlined_call_operand.vmem [shape: f32[1,256], index: 2, kind: input, shape index: {}]   ;;  %s348_s3 = inlined_call_operand.hbm [shape: bf16[16,256], index: 3, kind: output, shape index: {}]  }
   0x1   :  { %9 = vsyncpa [#allocation6], 0 }
   0x2   :  { %10 = vsyncpa [#allocation4], 0  ;;  %s299_s12 = smov [#allocation2]  }
   0x3   :  { %s16_s13 = sshll.u32 %s299_s12, 4  ;;  %s17_s13 = int_to_ptr.vmem [resolvable:$true] %s16_s13 }
   0x4   :  { %s241_s14 = scalar_lea.vmem %s17_s13, 128  ;;  %p246_p1 = scmp.lt.s32.totalorder %s17_s13, %s17_s13 }
   0x5   :  { %p242_p0 = scmp.ne.s32.totalorder %s17_s13, %s241_s14  ;;  %p247_p2 = scmp.lt.s32.totalorder %s241_s14, %s241_s14 }
   0x7   :  { %p248_p3 = por %p247_p2, %p246_p1 }
   0x9   :  { %p249_p4 = pnand %p248_p3, %p242_p0 }
   0xb   :  { %252 = shalt.err (!%p249_p4)
}
   0xc   :  { %s300_s15 = smov 64   ;;  %s301_s16 = smov 4  }
   0xd   :  { %22 = dma.hbm_to_vmem [thread:$0]  %s345_s0, 128, %s17_s13, [#allocation3], %s300_s15, %s300_s15, %s301_s16  }
   0xe   :  { %s302_s19 = smov [#allocation5]  }
   0xf   :  { %s28_s20 = sshll.u32 %s302_s19, 4  ;;  %s29_s20 = int_to_ptr.vmem [resolvable:$true] %s28_s20 }
  0x10   :  { %s261_s21 = scalar_lea.vmem %s29_s20, 512  ;;  %p266_p6 = scmp.lt.s32.totalorder %s29_s20, %s29_s20 }
  0x11   :  { %p262_p5 = scmp.ne.s32.totalorder %s29_s20, %s261_s21  ;;  %p267_p7 = scmp.lt.s32.totalorder %s261_s21, %s261_s21 }
  0x13   :  { %p268_p8 = por %p267_p7, %p266_p6 }
  0x15   :  { %p269_p9 = pnand %p268_p8, %p262_p5 }
  0x17   :  { %272 = shalt.err (!%p269_p9)
}
  0x18   :  { %s303_s22 = smov 128   ;;  %s304_s23 = smov 8  }
  0x19   :  { %34 = dma.hbm_to_vmem [thread:$0]  %s346_s1, 512, %s29_s20, [#allocation6], %s303_s22, %s303_s22, %s304_s23  }
  0x1a   :  { %293 = dma.done.wait [#allocation3], 128  }
  0x1b   :  { %294 = vsyncadd [#allocation3], 4294967168 }
  0x1c   :  { %295 = dma.done.wait [#allocation6], 512  }
  0x1d   :  { %296 = vsyncadd [#allocation6], 4294966784  ;;  %v305_v0 = vmov 0   ;;  %v214_v1 = vld [vmem:[#allocation5 + $0x14] ss:$8 sps:$4 sm:$0xff]   ;;  %vm87_vm0 = vcmask 261120   ;;  %v52_v6 = vlaneseq }
  0x1e   :  { %123 = vmatprep.mubr.bf16.mxu0 %v305_v0  ;;  %v216_v2 = vld [vmem:[#allocation5 + $0x10] ss:$8 sps:$4 sm:$0xff]   ;;  %103 = vmatprep.subr.bf16.mxu0 %v214_v1  ;;  %v217_v3 = vld [vmem:[#allocation5 + $0x4] ss:$8 sps:$4 sm:$0xff]   ;;  %v219_v4 = vld [vmem:[#allocation5] ss:$8 sps:$4 sm:$0xff]  }
  0x1f   :  { %104 = vmatpush1.bf16.msra.mxu0 %v216_v2  ;;  %v220_v5 = vld [vmem:[#allocation2] sm:$0xff]   ;;  %v53_v7 = vshrl.u32 %v52_v6, 7 }
  0x20   :  { %105 = vmatprep.subr.bf16.mxu0 %v217_v3  ;;  %v50_v10 = vld [vmem:[%s347_s2] sm:$0x3]  ;;  %s306_s2 = smov [#allocation7]  }
  0x21   :  { %v54_v8 = vsub.s32 0, %v53_v7  ;;  %v58_v9 = vsub.s32 1, %v53_v7  ;;  %s183_s26 = sshll.u32 %s306_s2, 4  ;;  %s184_s26 = int_to_ptr.vmem [resolvable:$true] %s183_s26 }
  0x22   :  { %s273_s27 = scalar_lea.vmem %s184_s26, 256  ;;  %p278_p11 = scmp.lt.s32.totalorder %s184_s26, %s184_s26 }
  0x23   :  { %106 = vmatpush1.bf16.msra.mxu0 %v219_v4  ;;  %v55_v11 = vrot.slane %v50_v10, %v54_v8  ;;  %v59_v12 = vrot.slane %v50_v10, %v58_v9  ;;  %p274_p10 = scmp.ne.s32.totalorder %s184_s26, %s273_s27  ;;  %p279_p12 = scmp.lt.s32.totalorder %s273_s27, %s273_s27 }
  0x25   :  { %p280_p13 = por %p279_p12, %p278_p11 }
  0x26   :  { %201 = vmatmul.mubr.msk.bf16.vlgmr.msra.gmra.mxu0 %vm87_vm0, %v220_v5 }
  0x27   :  { %p281_p0 = pnand %p280_p13, %p274_p10 }
  0xe6   :  { %v125_v13 = vpop.f32.mrf.mxu0 }
  0xe7   :  { %v126_v15 = vadd.f32 %v125_v13, %v55_v11 }
  0xe8   :  { %v127_v14 = vpop.f32.mrf.mxu0 }
  0xe9   :  { %v128_v16 = vadd.f32 %v127_v14, %v59_v12 }
  0xea   :  { %v129_v17 = vpop.f32.mrf.mxu0 }
  0xeb   :  { %v134_v18 = vmax.f32 %v126_v15, %v128_v16  ;;  %v130_v20 = vadd.f32 %v129_v17, %v55_v11 }
  0xec   :  { %v131_v19 = vpop.f32.mrf.mxu0 }
  0xed   :  { %v132_v21 = vadd.f32 %v131_v19, %v59_v12  ;;  %135 = vmax.xlane.f32.xlu0 %v134_v18 }
  0xef   :  { %v137_v22 = vmax.f32 %v130_v20, %v132_v21 }
  0xf1   :  { %138 = vmax.xlane.f32.xlu0 %v137_v22 }
 0x176   :  { %v136_v23 = vpop.xlane.xlu0 %135 }
 0x177   :  { %v140_v24 = vsub.f32 %v126_v15, %v136_v23  ;;  %v141_v25 = vsub.f32 %v128_v16, %v136_v23 }
 0x179   :  { %v144_v26 = vmul.f32 1.442695, %v140_v24  ;;  %v146_v27 = vmul.f32 1.442695, %v141_v25 }
 0x17a   :  { %v139_v28 = vpop.xlane.xlu0 %138 }
 0x17b   :  { %221 = vpow2.f32 %v144_v26  ;;  %v142_v29 = vsub.f32 %v130_v20, %v139_v28  ;;  %v143_v30 = vsub.f32 %v132_v21, %v139_v28 }
 0x17c   :  { %223 = vpow2.f32 %v146_v27 }
 0x17d   :  { %v148_v31 = vmul.f32 1.442695, %v142_v29  ;;  %v150_v32 = vmul.f32 1.442695, %v143_v30 }
 0x17f   :  { %225 = vpow2.f32 %v148_v31 }
 0x180   :  { %227 = vpow2.f32 %v150_v32 }
 0x188   :  { %v222_v33 = vpop.eup %221 }
 0x189   :  { %v224_v34 = vpop.eup %223 }
 0x18a   :  { %v152_v35 = vadd.f32 %v224_v34, %v222_v33 }
 0x18c   :  { %v226_v36 = vpop.eup %225  ;;  %153 = vadd.xlane.f32.xlu1 %v152_v35 }
 0x18d   :  { %v228_v37 = vpop.eup %227 }
 0x18e   :  { %v155_v38 = vadd.f32 %v228_v37, %v226_v36 }
 0x190   :  { %156 = vadd.xlane.f32.xlu1 %v155_v38 }
 0x215   :  { %v154_v39 = vpop.xlane.xlu1 %153 }
 0x216   :  { %229 = vrcp.f32 %v154_v39 }
 0x219   :  { %v157_v40 = vpop.xlane.xlu1 %156 }
 0x21a   :  { %231 = vrcp.f32 %v157_v40 }
 0x223   :  { %v230_v41 = vpop.eup %229 }
 0x224   :  { %v160_v42 = vmul.f32 %v230_v41, %v222_v33  ;;  %v161_v43 = vmul.f32 %v230_v41, %v224_v34 }
 0x226   :  { %v204_v44 = vpack.c.bf16 %v161_v43, %v160_v42 }
 0x227   :  { %v232_v45 = vpop.eup %231 }
 0x228   :  { %v162_v46 = vmul.f32 %v232_v45, %v226_v36  ;;  %v163_v47 = vmul.f32 %v232_v45, %v228_v37  ;;  %176 = vst [vmem:[#allocation7] sm:$0xff] %v204_v44 }
 0x22a   :  { %v205_v48 = vpack.c.bf16 %v163_v47, %v162_v46 }
 0x22c   :  { %177 = vst [vmem:[#allocation7 + $0x8] sm:$0xff] %v205_v48 }
 0x22d   :  { %284 = shalt.err (!%p281_p0)
}
 0x22e   :  { %189 = dma.vmem_to_hbm [thread:$0]  %s184_s26, 256, %s348_s3, [#allocation4], %s303_s22, %s303_s22, %s304_s23  }
 0x22f   :  { %297 = dma.done.wait [#allocation4], 256  }
 0x230   :  { %298 = vsyncadd [#allocation4], 4294967040 }
 0x231   :  { %193 = vsyncpa [#allocation3], 1 }
 0x232   :  { %194 = vsyncpa [#allocation6], 1 }
 0x233   :  { %195 = vsyncpa [#allocation4], 1 }

</bundles_post_ra>
